<compile_context>
chip_gen: v7x
topology: tpu7x:2x2x1
jax: 0.10.0
libtpu: 0.0.40
codegen_flags: <defaults>
</compile_context>

<pallas_src>
import functools
import math

import jax
import jax.numpy as jnp
from jax.experimental import pallas as pl
from jax.experimental.pallas import tpu as pltpu


def _round_up(v, m):
    return -(-v // m) * m


def _rotate_filters(w, output_rot_dim):
    """Replicates GroupConv.trans_filter for input_rot_dim == 1.

    Matches F.affine_grid + F.grid_sample (bilinear, padding_mode='zeros',
    align_corners=False).  The depth (input_rot_dim=1) axis is an exact
    passthrough (z_in = 0 maps to the single slice center).

    w: (O, C, k, k) float32  ->  (R, O, C, k, k) float32
    """
    # TODO(synk): cross-check once against torch.nn.functional.grid_sample for
    # R > 1 (the in-script reference shares this rotation code, so only the
    # convolution path is validated non-circularly).
    O, C, k, _ = w.shape
    # normalized output coords, align_corners=False: (2*i + 1)/k - 1
    idx = (2.0 * jnp.arange(k, dtype=jnp.float32) + 1.0) / k - 1.0
    gy = idx[:, None]  # rows  -> normalized y
    gx = idx[None, :]  # cols  -> normalized x

    def rotate_one(theta):
        cos, sin = jnp.cos(theta), jnp.sin(theta)
        x_in = cos * gx + sin * gy          # row 0 of the affine matrix
        y_in = -sin * gx + cos * gy         # row 1 of the affine matrix
        # unnormalize (align_corners=False): pix = ((coord + 1) * size - 1) / 2
        u = ((x_in + 1.0) * k - 1.0) / 2.0  # input col coordinate
        v = ((y_in + 1.0) * k - 1.0) / 2.0  # input row coordinate
        u0 = jnp.floor(u)
        v0 = jnp.floor(v)
        wu1 = u - u0
        wu0 = 1.0 - wu1
        wv1 = v - v0
        wv0 = 1.0 - wv1

        def gather(vv, uu):
            inb = (vv >= 0) & (vv < k) & (uu >= 0) & (uu < k)
            vc = jnp.clip(vv, 0, k - 1).astype(jnp.int32)
            uc = jnp.clip(uu, 0, k - 1).astype(jnp.int32)
            vals = w[:, :, vc, uc]                      # (O, C, k, k)
            return jnp.where(inb[None, None], vals, 0.0)

        return ((wv0 * wu0) * gather(v0, u0)
                + (wv0 * wu1) * gather(v0, u0 + 1.0)
                + (wv1 * wu0) * gather(v0 + 1.0, u0)
                + (wv1 * wu1) * gather(v0 + 1.0, u0 + 1.0))

    thetas = (2.0 * jnp.pi / output_rot_dim) * jnp.arange(
        output_rot_dim, dtype=jnp.float32)
    return jax.vmap(rotate_one)(thetas)                 # (R, O, C, k, k)


def _rotconv_kernel(x_ref, w_ref, b_ref, o_ref, *, k, stride, w_phase, l_out):
    # x_ref: (1, 1, P, C, Lin) bf16 -- phase-decomposed flat padded image slabs
    #        (P = stride*stride phases, Lin multiple of 128, halo zero-padded)
    # w_ref: (1, k*k, O, C) bf16    -- rotated filter, one (O, C) slab per tap
    # b_ref: (O, 1) f32             -- bias (broadcast over the flat spatial dim)
    # o_ref: (1, 1, O, l_out) f32   -- lane-dense output slab (phase-(0,0) grid)
    acc = jnp.zeros((o_ref.shape[2], o_ref.shape[3]), jnp.float32)
    for kh in range(k):                 # static k*k tap loop, fully unrolled
        for kw in range(k):
            p = (kh % stride) * stride + (kw % stride)      # phase index
            d = (kh // stride) * w_phase + (kw // stride)   # flat shift in phase
            xs = x_ref[0, 0, p, :, pl.ds(d, l_out)]          # (C, l_out) bf16
            wt = w_ref[0, kh * k + kw]                        # (O, C) bf16
            acc = acc + jax.lax.dot_general(
                wt, xs,
                dimension_numbers=(((1,), (0,)), ((), ())),
                preferred_element_type=jnp.float32)           # MXU, f32 acc
    o_ref[0, 0] = (acc + b_ref[...]).astype(o_ref.dtype)      # bias in epilogue


@functools.partial(jax.jit, static_argnames=("stride", "padding"))
def group_rotation_wise_conv(x, weight, bias, *, stride=1, padding=0):
    """x: (B, C_in, R, H, W); weight: (O, C_in, 1, k, k); bias: (O,)
    Returns (B, O, R, H_out, W_out) -- same as the PyTorch module."""
    B, C, R, H, W = x.shape
    O, Cw, one, k, _ = weight.shape
    assert C == Cw and one == 1
    s = int(stride)

    # --- parameter setup: rotated filters, per-tap (O, C) slabs: (R, k*k, O, C)
    tw = _rotate_filters(weight[:, :, 0].astype(jnp.float32), R)   # (R, O, C, k, k)
    w_taps = jnp.transpose(tw, (0, 3, 4, 1, 2)).reshape(R, k * k, O, C)
    w_taps = w_taps.astype(jnp.bfloat16)

    # --- output geometry (same as F.conv2d)
    Hp, Wp = H + 2 * padding, W + 2 * padding
    Ho = (Hp - k) // s + 1
    Wo = (Wp - k) // s + 1

    # --- layout plumbing (all bf16, cast immediately; ~1x input traffic)
    #     pad so padded dims divide the stride -> equal-size phase grids
    Hpp = _round_up(Hp, s)
    Wpp = _round_up(Wp, s)
    Hs, Ws = Hpp // s, Wpp // s
    P = s * s

    xk = jnp.transpose(x.astype(jnp.bfloat16), (2, 0, 1, 3, 4))    # (R, B, C, H, W)
    xk = jnp.pad(xk, ((0, 0), (0, 0), (0, 0),
                      (padding, Hpp - H - padding),
                      (padding, Wpp - W - padding)))
    # stride^2 phase decomposition: each conv tap becomes a pure flat shift
    # inside one phase slab (so the kernel only needs contiguous pl.ds loads).
    xk = xk.reshape(R, B, C, Hs, s, Ws, s)
    xk = jnp.transpose(xk, (0, 1, 4, 6, 2, 3, 5)).reshape(R, B, P, C, Hs * Ws)

    # lane-dense output length (multiple of 128) + halo-padded input length
    max_shift = ((k - 1) // s) * Ws + ((k - 1) // s)
    Lout = _round_up(Hs * Ws, 128)
    Lin = _round_up(Lout + max_shift, 128)
    xk = jnp.pad(xk, ((0, 0), (0, 0), (0, 0), (0, 0), (0, Lin - Hs * Ws)))

    b2 = bias.reshape(O, 1).astype(jnp.float32)

    kern = functools.partial(_rotconv_kernel, k=k, stride=s, w_phase=Ws,
                             l_out=Lout)

    y = pl.pallas_call(
        kern,
        out_shape=jax.ShapeDtypeStruct((R, B, O, Lout), jnp.float32),
        grid_spec=pltpu.PrefetchScalarGridSpec(
            num_scalar_prefetch=0,
            grid=(R, B),                       # batch innermost: weight block
            in_specs=[                         # index stays constant -> resident
                pl.BlockSpec((1, 1, P, C, Lin), lambda r, b: (r, b, 0, 0, 0)),
                pl.BlockSpec((1, k * k, O, C), lambda r, b: (r, 0, 0, 0)),
                pl.BlockSpec((O, 1), lambda r, b: (0, 0)),
            ],
            out_specs=pl.BlockSpec((1, 1, O, Lout), lambda r, b: (r, b, 0, 0)),
        ),
        compiler_params=pltpu.CompilerParams(
            dimension_semantics=("parallel", "parallel"),   # v7x: 2 TCs
            vmem_limit_bytes=32 * 1024 * 1024),
    )(xk, w_taps, b2)

    # (R, B, O, Lout): valid outputs live on the phase-(0,0) grid (Hs, Ws);
    # keep the top-left (Ho, Wo) region, then go to the PyTorch layout.
    y = y[:, :, :, :Hs * Ws].reshape(R, B, O, Hs, Ws)[:, :, :, :Ho, :Wo]
    return jnp.transpose(y, (1, 2, 0, 3, 4))            # (B, O, R, Ho, Wo)


def _reference(x, weight, bias, *, stride, padding):
    """Pure-JAX reference (f32 lax conv per rotation group) for validation."""
    B, C, R, H, W = x.shape
    O = weight.shape[0]
    tw = _rotate_filters(weight[:, :, 0].astype(jnp.float32), R)
    outs = []
    for i in range(R):
        yi = jax.lax.conv_general_dilated(
            x[:, :, i].astype(jnp.float32), tw[i],
            window_strides=(stride, stride),
            padding=[(padding, padding), (padding, padding)],
            dimension_numbers=("NCHW", "OIHW", "NCHW"),
            precision=jax.lax.Precision.HIGHEST)
        outs.append(yi)
    y = jnp.stack(outs, axis=2)
    return y + bias.reshape(1, O, 1, 1, 1)


if __name__ == "__main__":
    # Small shapes consistent with the module's forward.
    B, C_in, O, k = 2, 4, 8, 3
    R = 4                      # output_rot_dim (class default is 16; small here)
    H = W = 16

    key = jax.random.PRNGKey(0)
    k_w, k_b, k_x = jax.random.split(key, 3)

    # reset_parameters(): uniform(-stdv, stdv), stdv = 1/sqrt(C_in * k * k)
    stdv = 1.0 / math.sqrt(C_in * k * k)
    weight = jax.random.uniform(k_w, (O, C_in, 1, k, k), jnp.float32,
                                minval=-stdv, maxval=stdv)
    bias = jax.random.uniform(k_b, (O,), jnp.float32, minval=-stdv, maxval=stdv)

    # input: (B, C_in, R, H, W), as sliced by forward() along dim 2
    x = jax.random.normal(k_x, (B, C_in, R, H, W), jnp.float32)

    # Exercise both the single-phase (stride=1) and multi-phase (stride=2) paths.
    for stride, padding in [(1, 1), (2, 1)]:
        y = group_rotation_wise_conv(x, weight, bias, stride=stride, padding=padding)
        y = jax.block_until_ready(y)
        y_ref = _reference(x, weight, bias, stride=stride, padding=padding)
        h_out = (H + 2 * padding - k) // stride + 1
        assert y.shape == (B, O, R, h_out, h_out), y.shape
        # bf16 MXU inputs with f32 accumulation -> ~1e-3 abs error vs f32 ref.
        assert bool(jnp.allclose(y, y_ref, atol=1e-2, rtol=1e-2)), \
            f"mismatch vs reference (stride={stride}, padding={padding})"

    print("KERNEL_OK")
</pallas_src>

<mosaic_0001>
module attributes {stable_mosaic.version = 11 : i64} {
  func.func @_rotconv_kernel(%arg0: i32, %arg1: i32, %arg2: memref<1x1x1x4x512xbf16, #tpu.memory_space<vmem>>, %arg3: memref<1x9x8x4xbf16, #tpu.memory_space<vmem>>, %arg4: memref<8x1xf32, #tpu.memory_space<vmem>>, %arg5: memref<1x1x8x384xf32, #tpu.memory_space<vmem>>) attributes {dimension_semantics = [#tpu.dimension_semantics<parallel>, #tpu.dimension_semantics<parallel>], iteration_bounds = array<i64: 4, 2>, scalar_prefetch = 0 : i64, scratch_operands = 0 : i64, tpu.core_type = #tpu.core_type<tc>, window_params = [{transform_indices = @transform_0, window_bounds = array<i64: 1, 1, 1, 4, 512>}, {transform_indices = @transform_1, window_bounds = array<i64: 1, 9, 8, 4>}, {pipeline_mode = #tpu.pipeline_mode<synchronous>, transform_indices = @transform_2, window_bounds = array<i64: 8, 1>}, {transform_indices = @transform_3, window_bounds = array<i64: 1, 1, 8, 384>}]} {
    %cst = arith.constant 0.000000e+00 : f32
    %0 = vector.broadcast %cst : f32 to vector<8x384xf32>
    %c0 = arith.constant 0 : index
    %c0_0 = arith.constant 0 : index
    %c0_1 = arith.constant 0 : index
    %c0_2 = arith.constant 0 : index
    %c0_3 = arith.constant 0 : index
    %1 = vector.load %arg2[%c0, %c0_0, %c0_1, %c0_2, %c0_3] : memref<1x1x1x4x512xbf16, #tpu.memory_space<vmem>>, vector<1x1x1x4x384xbf16>
    %2 = vector.shape_cast %1 : vector<1x1x1x4x384xbf16> to vector<4x384xbf16>
    %c0_4 = arith.constant 0 : index
    %c0_5 = arith.constant 0 : index
    %c0_6 = arith.constant 0 : index
    %c0_7 = arith.constant 0 : index
    %3 = vector.load %arg3[%c0_4, %c0_5, %c0_6, %c0_7] : memref<1x9x8x4xbf16, #tpu.memory_space<vmem>>, vector<1x1x8x4xbf16>
    %4 = vector.shape_cast %3 : vector<1x1x8x4xbf16> to vector<8x4xbf16>
    %cst_8 = arith.constant dense<0.000000e+00> : vector<8x384xf32>
    %5 = tpu.matmul %4, %2, %cst_8 {dimension_numbers = #tpu.dot_dimension_numbers<[1], [0], [0], [1], [0, 0, 1, 1], [], []>} : vector<8x4xbf16>, vector<4x384xbf16>, vector<8x384xf32> -> vector<8x384xf32>
    %6 = arith.addf %0, %5 : vector<8x384xf32>
    %c0_9 = arith.constant 0 : index
    %c0_10 = arith.constant 0 : index
    %c0_11 = arith.constant 0 : index
    %c0_12 = arith.constant 0 : index
    %c1 = arith.constant 1 : index
    %7 = vector.load %arg2[%c0_9, %c0_10, %c0_11, %c0_12, %c1] : memref<1x1x1x4x512xbf16, #tpu.memory_space<vmem>>, vector<1x1x1x4x384xbf16>
    %8 = vector.shape_cast %7 : vector<1x1x1x4x384xbf16> to vector<4x384xbf16>
    %c0_13 = arith.constant 0 : index
    %c1_14 = arith.constant 1 : index
    %c0_15 = arith.constant 0 : index
    %c0_16 = arith.constant 0 : index
    %9 = vector.load %arg3[%c0_13, %c1_14, %c0_15, %c0_16] : memref<1x9x8x4xbf16, #tpu.memory_space<vmem>>, vector<1x1x8x4xbf16>
    %10 = vector.shape_cast %9 : vector<1x1x8x4xbf16> to vector<8x4xbf16>
    %cst_17 = arith.constant dense<0.000000e+00> : vector<8x384xf32>
    %11 = tpu.matmul %10, %8, %cst_17 {dimension_numbers = #tpu.dot_dimension_numbers<[1], [0], [0], [1], [0, 0, 1, 1], [], []>} : vector<8x4xbf16>, vector<4x384xbf16>, vector<8x384xf32> -> vector<8x384xf32>
    %12 = arith.addf %6, %11 : vector<8x384xf32>
    %c0_18 = arith.constant 0 : index
    %c0_19 = arith.constant 0 : index
    %c0_20 = arith.constant 0 : index
    %c0_21 = arith.constant 0 : index
    %c2 = arith.constant 2 : index
    %13 = vector.load %arg2[%c0_18, %c0_19, %c0_20, %c0_21, %c2] : memref<1x1x1x4x512xbf16, #tpu.memory_space<vmem>>, vector<1x1x1x4x384xbf16>
    %14 = vector.shape_cast %13 : vector<1x1x1x4x384xbf16> to vector<4x384xbf16>
    %c0_22 = arith.constant 0 : index
    %c2_23 = arith.constant 2 : index
    %c0_24 = arith.constant 0 : index
    %c0_25 = arith.constant 0 : index
    %15 = vector.load %arg3[%c0_22, %c2_23, %c0_24, %c0_25] : memref<1x9x8x4xbf16, #tpu.memory_space<vmem>>, vector<1x1x8x4xbf16>
    %16 = vector.shape_cast %15 : vector<1x1x8x4xbf16> to vector<8x4xbf16>
    %cst_26 = arith.constant dense<0.000000e+00> : vector<8x384xf32>
    %17 = tpu.matmul %16, %14, %cst_26 {dimension_numbers = #tpu.dot_dimension_numbers<[1], [0], [0], [1], [0, 0, 1, 1], [], []>} : vector<8x4xbf16>, vector<4x384xbf16>, vector<8x384xf32> -> vector<8x384xf32>
    %18 = arith.addf %12, %17 : vector<8x384xf32>
    %c0_27 = arith.constant 0 : index
    %c0_28 = arith.constant 0 : index
    %c0_29 = arith.constant 0 : index
    %c0_30 = arith.constant 0 : index
    %c18 = arith.constant 18 : index
    %19 = vector.load %arg2[%c0_27, %c0_28, %c0_29, %c0_30, %c18] : memref<1x1x1x4x512xbf16, #tpu.memory_space<vmem>>, vector<1x1x1x4x384xbf16>
    %20 = vector.shape_cast %19 : vector<1x1x1x4x384xbf16> to vector<4x384xbf16>
    %c0_31 = arith.constant 0 : index
    %c3 = arith.constant 3 : index
    %c0_32 = arith.constant 0 : index
    %c0_33 = arith.constant 0 : index
    %21 = vector.load %arg3[%c0_31, %c3, %c0_32, %c0_33] : memref<1x9x8x4xbf16, #tpu.memory_space<vmem>>, vector<1x1x8x4xbf16>
    %22 = vector.shape_cast %21 : vector<1x1x8x4xbf16> to vector<8x4xbf16>
    %cst_34 = arith.constant dense<0.000000e+00> : vector<8x384xf32>
    %23 = tpu.matmul %22, %20, %cst_34 {dimension_numbers = #tpu.dot_dimension_numbers<[1], [0], [0], [1], [0, 0, 1, 1], [], []>} : vector<8x4xbf16>, vector<4x384xbf16>, vector<8x384xf32> -> vector<8x384xf32>
    %24 = arith.addf %18, %23 : vector<8x384xf32>
    %c0_35 = arith.constant 0 : index
    %c0_36 = arith.constant 0 : index
    %c0_37 = arith.constant 0 : index
    %c0_38 = arith.constant 0 : index
    %c19 = arith.constant 19 : index
    %25 = vector.load %arg2[%c0_35, %c0_36, %c0_37, %c0_38, %c19] : memref<1x1x1x4x512xbf16, #tpu.memory_space<vmem>>, vector<1x1x1x4x384xbf16>
    %26 = vector.shape_cast %25 : vector<1x1x1x4x384xbf16> to vector<4x384xbf16>
    %c0_39 = arith.constant 0 : index
    %c4 = arith.constant 4 : index
    %c0_40 = arith.constant 0 : index
    %c0_41 = arith.constant 0 : index
    %27 = vector.load %arg3[%c0_39, %c4, %c0_40, %c0_41] : memref<1x9x8x4xbf16, #tpu.memory_space<vmem>>, vector<1x1x8x4xbf16>
    %28 = vector.shape_cast %27 : vector<1x1x8x4xbf16> to vector<8x4xbf16>
    %cst_42 = arith.constant dense<0.000000e+00> : vector<8x384xf32>
    %29 = tpu.matmul %28, %26, %cst_42 {dimension_numbers = #tpu.dot_dimension_numbers<[1], [0], [0], [1], [0, 0, 1, 1], [], []>} : vector<8x4xbf16>, vector<4x384xbf16>, vector<8x384xf32> -> vector<8x384xf32>
    %30 = arith.addf %24, %29 : vector<8x384xf32>
    %c0_43 = arith.constant 0 : index
    %c0_44 = arith.constant 0 : index
    %c0_45 = arith.constant 0 : index
    %c0_46 = arith.constant 0 : index
    %c20 = arith.constant 20 : index
    %31 = vector.load %arg2[%c0_43, %c0_44, %c0_45, %c0_46, %c20] : memref<1x1x1x4x512xbf16, #tpu.memory_space<vmem>>, vector<1x1x1x4x384xbf16>
    %32 = vector.shape_cast %31 : vector<1x1x1x4x384xbf16> to vector<4x384xbf16>
    %c0_47 = arith.constant 0 : index
    %c5 = arith.constant 5 : index
    %c0_48 = arith.constant 0 : index
    %c0_49 = arith.constant 0 : index
    %33 = vector.load %arg3[%c0_47, %c5, %c0_48, %c0_49] : memref<1x9x8x4xbf16, #tpu.memory_space<vmem>>, vector<1x1x8x4xbf16>
    %34 = vector.shape_cast %33 : vector<1x1x8x4xbf16> to vector<8x4xbf16>
    %cst_50 = arith.constant dense<0.000000e+00> : vector<8x384xf32>
    %35 = tpu.matmul %34, %32, %cst_50 {dimension_numbers = #tpu.dot_dimension_numbers<[1], [0], [0], [1], [0, 0, 1, 1], [], []>} : vector<8x4xbf16>, vector<4x384xbf16>, vector<8x384xf32> -> vector<8x384xf32>
    %36 = arith.addf %30, %35 : vector<8x384xf32>
    %c0_51 = arith.constant 0 : index
    %c0_52 = arith.constant 0 : index
    %c0_53 = arith.constant 0 : index
    %c0_54 = arith.constant 0 : index
    %c36 = arith.constant 36 : index
    %37 = vector.load %arg2[%c0_51, %c0_52, %c0_53, %c0_54, %c36] : memref<1x1x1x4x512xbf16, #tpu.memory_space<vmem>>, vector<1x1x1x4x384xbf16>
    %38 = vector.shape_cast %37 : vector<1x1x1x4x384xbf16> to vector<4x384xbf16>
    %c0_55 = arith.constant 0 : index
    %c6 = arith.constant 6 : index
    %c0_56 = arith.constant 0 : index
    %c0_57 = arith.constant 0 : index
    %39 = vector.load %arg3[%c0_55, %c6, %c0_56, %c0_57] : memref<1x9x8x4xbf16, #tpu.memory_space<vmem>>, vector<1x1x8x4xbf16>
    %40 = vector.shape_cast %39 : vector<1x1x8x4xbf16> to vector<8x4xbf16>
    %cst_58 = arith.constant dense<0.000000e+00> : vector<8x384xf32>
    %41 = tpu.matmul %40, %38, %cst_58 {dimension_numbers = #tpu.dot_dimension_numbers<[1], [0], [0], [1], [0, 0, 1, 1], [], []>} : vector<8x4xbf16>, vector<4x384xbf16>, vector<8x384xf32> -> vector<8x384xf32>
    %42 = arith.addf %36, %41 : vector<8x384xf32>
    %c0_59 = arith.constant 0 : index
    %c0_60 = arith.constant 0 : index
    %c0_61 = arith.constant 0 : index
    %c0_62 = arith.constant 0 : index
    %c37 = arith.constant 37 : index
    %43 = vector.load %arg2[%c0_59, %c0_60, %c0_61, %c0_62, %c37] : memref<1x1x1x4x512xbf16, #tpu.memory_space<vmem>>, vector<1x1x1x4x384xbf16>
    %44 = vector.shape_cast %43 : vector<1x1x1x4x384xbf16> to vector<4x384xbf16>
    %c0_63 = arith.constant 0 : index
    %c7 = arith.constant 7 : index
    %c0_64 = arith.constant 0 : index
    %c0_65 = arith.constant 0 : index
    %45 = vector.load %arg3[%c0_63, %c7, %c0_64, %c0_65] : memref<1x9x8x4xbf16, #tpu.memory_space<vmem>>, vector<1x1x8x4xbf16>
    %46 = vector.shape_cast %45 : vector<1x1x8x4xbf16> to vector<8x4xbf16>
    %cst_66 = arith.constant dense<0.000000e+00> : vector<8x384xf32>
    %47 = tpu.matmul %46, %44, %cst_66 {dimension_numbers = #tpu.dot_dimension_numbers<[1], [0], [0], [1], [0, 0, 1, 1], [], []>} : vector<8x4xbf16>, vector<4x384xbf16>, vector<8x384xf32> -> vector<8x384xf32>
    %48 = arith.addf %42, %47 : vector<8x384xf32>
    %c0_67 = arith.constant 0 : index
    %c0_68 = arith.constant 0 : index
    %c0_69 = arith.constant 0 : index
    %c0_70 = arith.constant 0 : index
    %c38 = arith.constant 38 : index
    %49 = vector.load %arg2[%c0_67, %c0_68, %c0_69, %c0_70, %c38] : memref<1x1x1x4x512xbf16, #tpu.memory_space<vmem>>, vector<1x1x1x4x384xbf16>
    %50 = vector.shape_cast %49 : vector<1x1x1x4x384xbf16> to vector<4x384xbf16>
    %c0_71 = arith.constant 0 : index
    %c8 = arith.constant 8 : index
    %c0_72 = arith.constant 0 : index
    %c0_73 = arith.constant 0 : index
    %51 = vector.load %arg3[%c0_71, %c8, %c0_72, %c0_73] : memref<1x9x8x4xbf16, #tpu.memory_space<vmem>>, vector<1x1x8x4xbf16>
    %52 = vector.shape_cast %51 : vector<1x1x8x4xbf16> to vector<8x4xbf16>
    %cst_74 = arith.constant dense<0.000000e+00> : vector<8x384xf32>
    %53 = tpu.matmul %52, %50, %cst_74 {dimension_numbers = #tpu.dot_dimension_numbers<[1], [0], [0], [1], [0, 0, 1, 1], [], []>} : vector<8x4xbf16>, vector<4x384xbf16>, vector<8x384xf32> -> vector<8x384xf32>
    %54 = arith.addf %48, %53 : vector<8x384xf32>
    %c0_75 = arith.constant 0 : index
    %c0_76 = arith.constant 0 : index
    %55 = vector.load %arg4[%c0_75, %c0_76] : memref<8x1xf32, #tpu.memory_space<vmem>>, vector<8x1xf32>
    %56 = vector.broadcast %55 : vector<8x1xf32> to vector<8x384xf32>
    %57 = arith.addf %54, %56 : vector<8x384xf32>
    %c0_77 = arith.constant 0 : index
    %c0_78 = arith.constant 0 : index
    %c0_79 = arith.constant 0 : index
    %c0_80 = arith.constant 0 : index
    %58 = vector.load %arg5[%c0_77, %c0_78, %c0_79, %c0_80] : memref<1x1x8x384xf32, #tpu.memory_space<vmem>>, vector<1x1x8x384xf32>
    %59 = vector.shape_cast %58 : vector<1x1x8x384xf32> to vector<8x384xf32>
    %60 = vector.shape_cast %57 : vector<8x384xf32> to vector<1x1x8x384xf32>
    tpu.vector_store %arg5[%c0_77, %c0_78, %c0_79, %c0_80], %60 {strides = array<i32>} : memref<1x1x8x384xf32, #tpu.memory_space<vmem>>, vector<1x1x8x384xf32>,
    return
  }
  func.func @transform_0(%arg0: i32, %arg1: i32) -> (i32, i32, i32, i32, i32) {
    %c0_i32 = arith.constant 0 : i32
    %c0_i32_0 = arith.constant 0 : i32
    %c0_i32_1 = arith.constant 0 : i32
    %c0_i32_2 = arith.constant 0 : i32
    return %arg0, %arg1, %c0_i32, %c0_i32_0, %c0_i32_1 : i32, i32, i32, i32, i32
  }
  func.func @transform_1(%arg0: i32, %arg1: i32) -> (i32, i32, i32, i32) {
    %c0_i32 = arith.constant 0 : i32
    %c0_i32_0 = arith.constant 0 : i32
    %c0_i32_1 = arith.constant 0 : i32
    %c0_i32_2 = arith.constant 0 : i32
    return %arg0, %c0_i32, %c0_i32_0, %c0_i32_1 : i32, i32, i32, i32
  }
  func.func @transform_2(%arg0: i32, %arg1: i32) -> (i32, i32) {
    %c0_i32 = arith.constant 0 : i32
    %c0_i32_0 = arith.constant 0 : i32
    %c0_i32_1 = arith.constant 0 : i32
    return %c0_i32, %c0_i32_0 : i32, i32
  }
  func.func @transform_3(%arg0: i32, %arg1: i32) -> (i32, i32, i32, i32) {
    %c0_i32 = arith.constant 0 : i32
    %c0_i32_0 = arith.constant 0 : i32
    %c0_i32_1 = arith.constant 0 : i32
    return %arg0, %arg1, %c0_i32, %c0_i32_0 : i32, i32, i32, i32
  }
}

</mosaic_0001>

<bundles_post_ra>
// kernel: group_rotation_wise_conv.1
= control target key start
LH: loop header
LB: loop body
LE: loop exit
PB: predicated region body
PF: predicated region fallthrough
CT: control target
= control target key end

     0   :  { %s1739_s12 = smov 0   ;;  %s1741_s13 = smov 0   ;;  %s1906_s0 = inlined_call_operand.vmem [shape: bf16[4,2,1,4,512], index: 0, kind: input, shape index: {}]   ;;  %s1907_s1 = inlined_call_operand.vmem [shape: bf16[4,9,8,4], index: 1, kind: input, shape index: {}]   ;;  %s1908_s2 = inlined_call_operand.vmem [shape: f32[8,1], index: 2, kind: input, shape index: {}]   ;;  %s1909_s3 = inlined_call_operand.vmem [shape: f32[4,2,8,384], index: 3, kind: output, shape index: {}]  }
   0x1   :  { %s1743_s14 = smov 0   ;;  %s1745_s15 = smov 0  }
   0x2   :  { %s1747_s16 = smov 0  }
   0x3 LB: > { %s22_s17 = sadd.s32 1, %s1697_s14  ;;  %s25_s18 = sadd.s32 1, %s1701_s15  ;;  %s1705_s16 = sphi %s1747_s16, %s13_s16   ;;  %s1701_s15 = sphi %s1745_s15, %s1913_s15   ;;  %s1697_s14 = sphi %s1743_s14, %s1912_s14   ;;  %s1693_s13 = sphi %s1741_s13, %s1911_s13   ;;  %s1689_s12 = sphi %s1739_s12, %s1910_s12  }
   0x4   : > { %p23_p0 = scmp.ge.s32.totalorder %s22_s17, 2  ;;  %p1494_p1 = scmp.ge.s32.totalorder %s1705_s16, 1 }
   0x5   : > { %p167_p2 = scmp.lt.s32.totalorder %s1705_s16, 9 }
   0x6   : > { %s1915_s17 = smov (%p23_p0, %s22_s17), 0  ;;  %s1917_s18 = smov (!%p23_p0, %s25_s18), %s1701_s15 }
   0x7   : > { %p168_p3 = pnand %p1494_p1, %p167_p2  ;;  %p27_p4 = scmp.ge.s32.totalorder %s1917_s18, 4 }
   0x8   : > { %p204_p5 = scmp.lt.s32.totalorder (!%p168_p3), %s1693_s13, 3  ;;  %p206_p6 = scmp.lt.s32.totalorder (!%p168_p3), %s1689_s12, 1  ;;  %v238_v0 = vlaneseq (!%p168_p3)  ;;  %v1707_v1 = vmov (!%p168_p3), 1983009808   ;;  %v1708_v6 = vmov (!%p168_p3), 0.0   ;;  %v1709_v7 = vmov (!%p168_p3), 0  }
   0x9   : > { %s1919_s18 = smov (%p27_p4, %s1917_s18), 0  ;;  %171 = sbr.rel (%p168_p3) target bundleno = 431 (0x1af), region = 32 }
   0xa   : > { %v236_v2 = vunpack.c.l.s4 (!%p168_p3), %v1707_v1  ;;  %v239_v3 = vshrl.u32 (!%p168_p3), %v238_v0, 7  ;;  %1555 = vmatprep.subr.bf16.mxu1 (!%p168_p3), %v1708_v6  ;;  %309 = vmatprep.mubr.bf16.mxu0 (!%p168_p3), %v1709_v7  ;;  %vm1710_vm0 = vmmov (!%p168_p3), 0   ;;  %s1711_s26 = smov (!%p168_p3), 127   ;;  %s1712_s27 = smov (!%p168_p3), 126   ;;  %v1371_v18 = vld [vmem:[%s1908_s2] sm:$0xff] (!%p168_p3)  ;;  %vm259_vm1 = vcmask (!%p168_p3), 1039360  }
   0xb   : > { %1664 = vset.pattern.permute.xlu0 (!%p168_p3), %v1709_v7  ;;  %1557 = vmatprep.mubr.msk.bf16.mxu1 (!%p168_p3), %vm1710_vm0, %v1708_v6  ;;  %s1713_s28 = smov (!%p168_p3), 110   ;;  %s1714_s29 = smov (!%p168_p3), 109   ;;  %vm267_vm2 = vcmask (!%p168_p3), 1041408   ;;  %vm263_vm3 = vcmask (!%p168_p3), 31744   ;;  %vm497_vm4 = vcmask (!%p168_p3), 1031168   ;;  %vm626_vm5 = vcmask (!%p168_p3), 900096  }
   0xc   : > { %v237_v4 = vunpack.c.0.s8 (!%p168_p3), %v236_v2  ;;  %s1715_s30 = smov (!%p168_p3), 108   ;;  %s1716_s4 = smov (!%p168_p3), 92   ;;  %vm755_vm6 = vcmask (!%p168_p3), 891904   ;;  %vm884_vm7 = vcmask (!%p168_p3), 883712   ;;  %vm1013_vm8 = vcmask (!%p168_p3), 752640  }
   0xd   : > { %s1717_s5 = smov (!%p168_p3), 91   ;;  %s1718_s6 = smov (!%p168_p3), 90   ;;  %vm1142_vm9 = vcmask (!%p168_p3), 744448   ;;  %vm1271_vm10 = vcmask (!%p168_p3), 736256  }
   0xe   : > { %v240_v5 = vsub.s32 (!%p168_p3), %v237_v4, %v239_v3 }
  0x10   : > { %s1921_s13 = smov (!%p204_p5, %s1693_s13), 3  ;;  %s1923_s12 = smov (!%p206_p6, %s1689_s12), 1 }
  0x11   : > { %s1496_s19 = sshll.u32 %s1921_s13, 3  ;;  %s1495_s20 = sshll.u32 %s1923_s12, 2 }
  0x12   : > { %s210_s21 = sadd.s32 %s1496_s19, %s1495_s20  ;;  %s1609_s9 = smul.u32 36, %s1921_s13 }
  0x13   : > { %s1497_s22 = sshll.u32 %s210_s21, 1  ;;  %s1610_s20 = smul.u32 3, %s1923_s12 }
  0x14   : > { %s212_s25 = scalar_lea.vmem %s1906_s0, %s1497_s22  ;;  %s1794_s19 = scalar_lea.vmem %s1907_s1, %s1609_s9 }
  0x15   : > { %v230_v8 = vld [vmem:[%s212_s25] sm:$0xff]  ;;  %v1507_v49 = vld [vmem:[%s1794_s19 + $0x8] sm:$0xf]  ;;  %v1511_v59 = vld [vmem:[%s1794_s19 + $0xc] sm:$0xf]  ;;  %s1611_s21 = smul.u32 6, %s1921_s13 }
  0x16   : > { %v228_v9 = vld [vmem:[%s212_s25] sm:$0x3f]  ;;  %v241_v10 = vrot.slane %v230_v8, %v240_v5  ;;  %v234_v11 = vcombine.high %v230_v8, %v230_v8 }
  0x17   : > { %v1783_v12 = vrot.slane %v228_v9, %v240_v5  ;;  %v359_v13 = vcombine.high %v228_v9, %v228_v9  ;;  %v1500_v28 = vld [vmem:[%s1794_s19 + $0x4] sm:$0xf]  ;;  %v229_v39 = vld [vmem:[%s1794_s19] sm:$0xf]  ;;  %s224_s22 = sadd.s32 %s1611_s21, %s1610_s20 }
  0x18   : > { %251 = vrot.lane.b32.xlu0 %v241_v10, %s1711_s26  ;;  %v249_v14 = vcombine.high %v241_v10, %v241_v10  ;;  %v248_v15 = vrot.slane %v234_v11, %v240_v5  ;;  %s1499_s23 = sshll.u32 %s224_s22, 3 }
  0x19   : > { %v1785_v16 = vrot.slane %v359_v13, %v240_v5  ;;  %v374_v22 = vcombine.high %v1783_v12, %v1783_v12  ;;  %v379_v31 = vsel %vm267_vm2, %v1783_v12, 0  ;;  %v1515_v5 = vld [vmem:[%s1794_s19 + $0x10] sm:$0xf]  ;;  %s226_s13 = scalar_lea.vmem %s1909_s3, %s1499_s23 }
  0x1a   : > { %255 = vrot.lane.b32.xlu1 %v248_v15, %s1711_s26  ;;  %v250_v17 = vcombine.high %v248_v15, %v248_v15 }
  0x1b   : > { %v385_v33 = vsel %vm267_vm2, %v1785_v16, 0 }
  0x1c   : > { %253 = vrot.lane.b32.xlu0 %v249_v14, %s1711_s26 }
  0x1e   : > { %257 = vrot.lane.b32.xlu1 %v250_v17, %s1711_s26 }
  0x20   : > { %489 = vrot.lane.b32.xlu0 %v241_v10, %s1712_s27 }
  0x22   : > { %491 = vrot.lane.b32.xlu1 %v249_v14, %s1712_s27 }
  0x24   : > { %493 = vrot.lane.b32.xlu0 %v248_v15, %s1712_s27 }
  0x26   : > { %495 = vrot.lane.b32.xlu1 %v250_v17, %s1712_s27 }
  0x28   : > { %618 = vrot.lane.b32.xlu0 %v241_v10, %s1713_s28 }
  0x2a   : > { %620 = vrot.lane.b32.xlu1 %v249_v14, %s1713_s28 }
  0x2c   : > { %622 = vrot.lane.b32.xlu0 %v248_v15, %s1713_s28 }
  0x2e   : > { %624 = vrot.lane.b32.xlu1 %v250_v17, %s1713_s28 }
  0x30   : > { %747 = vrot.lane.b32.xlu0 %v241_v10, %s1714_s29 }
  0x32   : > { %749 = vrot.lane.b32.xlu1 %v249_v14, %s1714_s29 }
  0x34   : > { %751 = vrot.lane.b32.xlu0 %v248_v15, %s1714_s29 }
  0x36   : > { %753 = vrot.lane.b32.xlu1 %v250_v17, %s1714_s29 }
  0x38   : > { %876 = vrot.lane.b32.xlu0 %v241_v10, %s1715_s30 }
  0x3a   : > { %878 = vrot.lane.b32.xlu1 %v249_v14, %s1715_s30 }
  0x3c   : > { %880 = vrot.lane.b32.xlu0 %v248_v15, %s1715_s30 }
  0x3e   : > { %882 = vrot.lane.b32.xlu1 %v250_v17, %s1715_s30 }
  0x40   : > { %1005 = vrot.lane.b32.xlu0 %v241_v10, %s1716_s4 }
  0x42   : > { %1007 = vrot.lane.b32.xlu1 %v249_v14, %s1716_s4 }
  0x44   : > { %1009 = vrot.lane.b32.xlu0 %v248_v15, %s1716_s4 }
  0x46   : > { %1011 = vrot.lane.b32.xlu1 %v250_v17, %s1716_s4 }
  0x48   : > { %1134 = vrot.lane.b32.xlu0 %v241_v10, %s1717_s5 }
  0x4a   : > { %1136 = vrot.lane.b32.xlu1 %v249_v14, %s1717_s5 }
  0x4c   : > { %1138 = vrot.lane.b32.xlu0 %v248_v15, %s1717_s5 }
  0x4e   : > { %1140 = vrot.lane.b32.xlu1 %v250_v17, %s1717_s5 }
  0x50   : > { %1263 = vrot.lane.b32.xlu0 %v241_v10, %s1718_s6 }
  0x52   : > { %1265 = vrot.lane.b32.xlu1 %v249_v14, %s1718_s6 }
  0x54   : > { %1267 = vrot.lane.b32.xlu0 %v248_v15, %s1718_s6 }
  0x56   : > { %1269 = vrot.lane.b32.xlu1 %v250_v17, %s1718_s6  ;;  %v1519_v17 = vld [vmem:[%s1794_s19 + $0x14] sm:$0xf] }
  0x58   : > { %1374 = vperm.xlu0 %1664, %v1371_v18  }
  0x8a   : > { %v252_v19 = vpop.permute.xlu0 %251 }
  0x8c   : > { %v256_v20 = vpop.permute.xlu1 %255 }
  0x8e   : > { %v254_v21 = vpop.permute.xlu0 %253 }
  0x8f   : > { %v261_v23 = vsel %vm259_vm1, %v254_v21, %v256_v20  ;;  %v260_v24 = vsel %vm259_vm1, %v252_v19, %v254_v21 }
  0x90   : > { %1501 = vmatprep.subr.msk.bf16.mxu0 %vm267_vm2, %v261_v23  ;;  %v258_v25 = vpop.permute.xlu1 %257  ;;  %v269_v26 = vsel %vm267_vm2, %v260_v24, 0 }
  0x91   : > { %278 = vmatpush1.bf16.msra.mxu0 %v269_v26  ;;  %v262_v27 = vsel %vm259_vm1, %v256_v20, %v258_v25 }
  0x92   : > { %v275_v29 = vsel %vm267_vm2, %v262_v27, 0  ;;  %v490_v30 = vpop.permute.xlu0 %489  ;;  %1504 = vmatprep.subr.msk.bf16.mxu0 %vm267_vm2, %v374_v22  ;;  %v1523_v27 = vld [vmem:[%s1794_s19 + $0x18] sm:$0xf] }
  0x93   : > { %1556 = vmatpush3.bf16.msra.mxu1 %v275_v29 }
  0x94   : > { %1502 = vmatmul.mubr.msk.bf16.vlgmr.msra.gmra.mrb[0].mxu0 %vm263_vm3, %v1500_v28  ;;  %1561 = vmatprep.subr.bf16.mxu1 %v1708_v6  ;;  %v492_v32 = vpop.permute.xlu1 %491 }
  0x95   : > { %388 = vmatpush1.bf16.msra.mxu0 %v379_v31  ;;  %419 = vmatprep.mubr.bf16.mxu0 %v1709_v7  ;;  %v498_v35 = vsel %vm497_vm4, %v490_v30, %v492_v32 }
  0x96   : > { %1558 = vmatmul.mubr.msk.bf16.vlgmr.msra.gmra.mrb[0].mxu1 %vm263_vm3, %v1500_v28  ;;  %v494_v34 = vpop.permute.xlu0 %493  ;;  %v505_v40 = vsel %vm267_vm2, %v498_v35, 0 }
  0x97   : > { %1562 = vmatpush3.bf16.msra.mxu1 %v385_v33  ;;  %v499_v36 = vsel %vm497_vm4, %v492_v32, %v494_v34  ;;  %1563 = vmatprep.mubr.msk.bf16.mxu1 %vm1710_vm0, %v1708_v6 }
  0x98   : > { %1508 = vmatprep.subr.msk.bf16.mxu0 %vm267_vm2, %v499_v36  ;;  %v496_v37 = vpop.permute.xlu1 %495  ;;  %1567 = vmatprep.subr.bf16.mxu1 %v1708_v6 }
  0x99   : > { %v500_v38 = vsel %vm497_vm4, %v494_v34, %v496_v37  ;;  %v1527_v37 = vld [vmem:[%s1794_s19 + $0x1c] sm:$0xf] }
  0x9a   : > { %v619_v41 = vpop.permute.xlu0 %618  ;;  %v511_v42 = vsel %vm267_vm2, %v500_v38, 0 }
  0x9c   : > { %1505 = vmatmul.mubr.msk.bf16.vlgmr.msra.gmra.mrb[4].mxu0 %vm263_vm3, %v229_v39  ;;  %v621_v43 = vpop.permute.xlu1 %620 }
  0x9d   : > { %514 = vmatpush1.bf16.msra.mxu0 %v505_v40  ;;  %545 = vmatprep.mubr.bf16.mxu0 %v1709_v7  ;;  %v627_v45 = vsel %vm626_vm5, %v619_v41, %v621_v43  ;;  %v1531_v40 = vld [vmem:[%s1794_s19 + $0x20] sm:$0xf] }
  0x9e   : > { %1564 = vmatmul.mubr.msk.bf16.vlgmr.msra.gmra.mrb[4].mxu1 %vm263_vm3, %v229_v39  ;;  %v623_v44 = vpop.permute.xlu0 %622  ;;  %v634_v50 = vsel %vm267_vm2, %v627_v45, 0 }
  0x9f   : > { %1568 = vmatpush3.bf16.msra.mxu1 %v511_v42  ;;  %v628_v46 = vsel %vm626_vm5, %v621_v43, %v623_v44  ;;  %1569 = vmatprep.mubr.msk.bf16.mxu1 %vm1710_vm0, %v1708_v6 }
  0xa0   : > { %1512 = vmatprep.subr.msk.bf16.mxu0 %vm267_vm2, %v628_v46  ;;  %v625_v47 = vpop.permute.xlu1 %624  ;;  %1573 = vmatprep.subr.bf16.mxu1 %v1708_v6 }
  0xa1   : > { %v629_v48 = vsel %vm626_vm5, %v623_v44, %v625_v47 }
  0xa2   : > { %v748_v51 = vpop.permute.xlu0 %747  ;;  %v640_v52 = vsel %vm267_vm2, %v629_v48, 0 }
  0xa4   : > { %1509 = vmatmul.mubr.msk.bf16.vlgmr.msra.gmra.mrb[8].mxu0 %vm263_vm3, %v1507_v49  ;;  %v750_v53 = vpop.permute.xlu1 %749 }
  0xa5   : > { %643 = vmatpush1.bf16.msra.mxu0 %v634_v50  ;;  %674 = vmatprep.mubr.bf16.mxu0 %v1709_v7  ;;  %v756_v55 = vsel %vm755_vm6, %v748_v51, %v750_v53 }
  0xa6   : > { %1570 = vmatmul.mubr.msk.bf16.vlgmr.msra.gmra.mrb[8].mxu1 %vm263_vm3, %v1507_v49  ;;  %v752_v54 = vpop.permute.xlu0 %751  ;;  %v763_v60 = vsel %vm267_vm2, %v756_v55, 0 }
  0xa7   : > { %1574 = vmatpush3.bf16.msra.mxu1 %v640_v52  ;;  %v757_v56 = vsel %vm755_vm6, %v750_v53, %v752_v54  ;;  %1575 = vmatprep.mubr.msk.bf16.mxu1 %vm1710_vm0, %v1708_v6 }
  0xa8   : > { %1516 = vmatprep.subr.msk.bf16.mxu0 %vm267_vm2, %v757_v56  ;;  %v754_v57 = vpop.permute.xlu1 %753  ;;  %1579 = vmatprep.subr.bf16.mxu1 %v1708_v6 }
  0xa9   : > { %v758_v58 = vsel %vm755_vm6, %v752_v54, %v754_v57 }
  0xaa   : > { %v877_v61 = vpop.permute.xlu0 %876  ;;  %v769_v62 = vsel %vm267_vm2, %v758_v58, 0 }
  0xac   : > { %1513 = vmatmul.mubr.msk.bf16.vlgmr.msra.gmra.mrb[12].mxu0 %vm263_vm3, %v1511_v59  ;;  %v879_v63 = vpop.permute.xlu1 %878 }
  0xad   : > { %772 = vmatpush1.bf16.msra.mxu0 %v763_v60  ;;  %803 = vmatprep.mubr.bf16.mxu0 %v1709_v7  ;;  %v885_v1 = vsel %vm884_vm7, %v877_v61, %v879_v63 }
  0xae   : > { %1576 = vmatmul.mubr.msk.bf16.vlgmr.msra.gmra.mrb[12].mxu1 %vm263_vm3, %v1511_v59  ;;  %v881_v0 = vpop.permute.xlu0 %880  ;;  %v892_v8 = vsel %vm267_vm2, %v885_v1, 0 }
  0xaf   : > { %1580 = vmatpush3.bf16.msra.mxu1 %v769_v62  ;;  %v886_v2 = vsel %vm884_vm7, %v879_v63, %v881_v0  ;;  %1581 = vmatprep.mubr.msk.bf16.mxu1 %vm1710_vm0, %v1708_v6 }
  0xb0   : > { %1520 = vmatprep.subr.msk.bf16.mxu0 %vm267_vm2, %v886_v2  ;;  %v883_v3 = vpop.permute.xlu1 %882  ;;  %1585 = vmatprep.subr.bf16.mxu1 %v1708_v6 }
  0xb1   : > { %v887_v4 = vsel %vm884_vm7, %v881_v0, %v883_v3 }
  0xb2   : > { %v1006_v9 = vpop.permute.xlu0 %1005  ;;  %v898_v10 = vsel %vm267_vm2, %v887_v4, 0 }
  0xb4   : > { %1517 = vmatmul.mubr.msk.bf16.vlgmr.msra.gmra.mrb[16].mxu0 %vm263_vm3, %v1515_v5  ;;  %v1008_v11 = vpop.permute.xlu1 %1007 }
  0xb5   : > { %901 = vmatpush1.bf16.msra.mxu0 %v892_v8  ;;  %932 = vmatprep.mubr.bf16.mxu0 %v1709_v7  ;;  %v1014_v13 = vsel %vm1013_vm8, %v1006_v9, %v1008_v11 }
  0xb6   : > { %1582 = vmatmul.mubr.msk.bf16.vlgmr.msra.gmra.mrb[16].mxu1 %vm263_vm3, %v1515_v5  ;;  %v1010_v12 = vpop.permute.xlu0 %1009  ;;  %v1021_v18 = vsel %vm267_vm2, %v1014_v13, 0 }
  0xb7   : > { %1586 = vmatpush3.bf16.msra.mxu1 %v898_v10  ;;  %v1015_v14 = vsel %vm1013_vm8, %v1008_v11, %v1010_v12  ;;  %1587 = vmatprep.mubr.msk.bf16.mxu1 %vm1710_vm0, %v1708_v6 }
  0xb8   : > { %1524 = vmatprep.subr.msk.bf16.mxu0 %vm267_vm2, %v1015_v14  ;;  %v1012_v15 = vpop.permute.xlu1 %1011  ;;  %1591 = vmatprep.subr.bf16.mxu1 %v1708_v6 }
  0xb9   : > { %v1016_v16 = vsel %vm1013_vm8, %v1010_v12, %v1012_v15 }
  0xba   : > { %v1135_v19 = vpop.permute.xlu0 %1134  ;;  %v1027_v20 = vsel %vm267_vm2, %v1016_v16, 0 }
  0xbc   : > { %1521 = vmatmul.mubr.msk.bf16.vlgmr.msra.gmra.mrb[20].mxu0 %vm263_vm3, %v1519_v17  ;;  %v1137_v21 = vpop.permute.xlu1 %1136 }
  0xbd   : > { %1030 = vmatpush1.bf16.msra.mxu0 %v1021_v18  ;;  %1061 = vmatprep.mubr.bf16.mxu0 %v1709_v7  ;;  %v1143_v23 = vsel %vm1142_vm9, %v1135_v19, %v1137_v21 }
  0xbe   : > { %1588 = vmatmul.mubr.msk.bf16.vlgmr.msra.gmra.mrb[20].mxu1 %vm263_vm3, %v1519_v17  ;;  %v1139_v22 = vpop.permute.xlu0 %1138  ;;  %v1150_v28 = vsel %vm267_vm2, %v1143_v23, 0 }
  0xbf   : > { %1592 = vmatpush3.bf16.msra.mxu1 %v1027_v20  ;;  %v1144_v24 = vsel %vm1142_vm9, %v1137_v21, %v1139_v22  ;;  %1593 = vmatprep.mubr.msk.bf16.mxu1 %vm1710_vm0, %v1708_v6 }
  0xc0   : > { %1528 = vmatprep.subr.msk.bf16.mxu0 %vm267_vm2, %v1144_v24  ;;  %v1141_v25 = vpop.permute.xlu1 %1140  ;;  %1597 = vmatprep.subr.bf16.mxu1 %v1708_v6 }
  0xc1   : > { %v1145_v26 = vsel %vm1142_vm9, %v1139_v22, %v1141_v25 }
  0xc2   : > { %v1264_v29 = vpop.permute.xlu0 %1263  ;;  %v1156_v30 = vsel %vm267_vm2, %v1145_v26, 0 }
  0xc4   : > { %1525 = vmatmul.mubr.msk.bf16.vlgmr.msra.gmra.mrb[24].mxu0 %vm263_vm3, %v1523_v27  ;;  %v1266_v31 = vpop.permute.xlu1 %1265 }
  0xc5   : > { %1159 = vmatpush1.bf16.msra.mxu0 %v1150_v28  ;;  %1190 = vmatprep.mubr.bf16.mxu0 %v1709_v7  ;;  %v1272_v33 = vsel %vm1271_vm10, %v1264_v29, %v1266_v31 }
  0xc6   : > { %1594 = vmatmul.mubr.msk.bf16.vlgmr.msra.gmra.mrb[24].mxu1 %vm263_vm3, %v1523_v27  ;;  %v1268_v32 = vpop.permute.xlu0 %1267  ;;  %v1279_v38 = vsel %vm267_vm2, %v1272_v33, 0 }
  0xc7   : > { %1598 = vmatpush3.bf16.msra.mxu1 %v1156_v30  ;;  %v1273_v34 = vsel %vm1271_vm10, %v1266_v31, %v1268_v32  ;;  %1599 = vmatprep.mubr.msk.bf16.mxu1 %vm1710_vm0, %v1708_v6 }
  0xc8   : > { %1532 = vmatprep.subr.msk.bf16.mxu0 %vm267_vm2, %v1273_v34  ;;  %v1270_v35 = vpop.permute.xlu1 %1269  ;;  %1603 = vmatprep.subr.bf16.mxu1 %v1708_v6 }
  0xc9   : > { %v1274_v36 = vsel %vm1271_vm10, %v1268_v32, %v1270_v35 }
  0xca   : > { %v1285_v39 = vsel %vm267_vm2, %v1274_v36, 0 }
  0xcc   : > { %1529 = vmatmul.mubr.msk.bf16.vlgmr.msra.gmra.mrb[28].mxu0 %vm263_vm3, %v1527_v37 }
  0xcd   : > { %1288 = vmatpush1.bf16.msra.mxu0 %v1279_v38  ;;  %1319 = vmatprep.mubr.bf16.mxu0 %v1709_v7 }
  0xce   : > { %1600 = vmatmul.mubr.msk.bf16.vlgmr.msra.gmra.mrb[28].mxu1 %vm263_vm3, %v1527_v37 }
  0xcf   : > { %1604 = vmatpush3.bf16.msra.mxu1 %v1285_v39  ;;  %1605 = vmatprep.mubr.msk.bf16.mxu1 %vm1710_vm0, %v1708_v6 }
  0xd4   : > { %1533 = vmatmul.mubr.msk.bf16.vlgmr.msra.gmra.mrb[32].mxu0 %vm263_vm3, %v1531_v40 }
  0xd6   : > { %1606 = vmatmul.mubr.msk.bf16.vlgmr.msra.gmra.mrb[32].mxu1 %vm263_vm3, %v1531_v40 }
 0x167   : > { %v311_v41 = vpop.f32.mrb[0].mxu0 }
 0x168   : > { %v313_v42 = vpop.f32.mrb[1].mxu0 }
 0x169   : > { %v315_v43 = vpop.f32.mrb[2].mxu0  ;;  %v352_v44 = vpop.f32.mrb[0].mxu1 }
 0x16a   : > { %v316_v45 = vpop.f32.mrb[3].mxu0  ;;  %v1559_v46 = vpop.f32.mrb[1].mxu1 }
 0x16b   : > { %v355_v47 = vpop.f32.mrb[2].mxu1 }
 0x16c   : > { %v1560_v48 = vpop.f32.mrb[3].mxu1 }
 0x16f   : > { %v421_v7 = vpop.f32.mrb[4].mxu0 }
 0x170   : > { %v422_v49 = vadd.f32 %v421_v7, %v311_v41  ;;  %v423_v50 = vpop.f32.mrb[5].mxu0 }
 0x171   : > { %v424_v51 = vadd.f32 %v423_v50, %v313_v42  ;;  %v425_v52 = vpop.f32.mrb[6].mxu0  ;;  %v462_v53 = vpop.f32.mrb[4].mxu1 }
 0x172   : > { %v463_v6 = vadd.f32 %v462_v53, %v352_v44  ;;  %v426_v54 = vpop.f32.mrb[7].mxu0  ;;  %v1565_v55 = vpop.f32.mrb[5].mxu1 }
 0x173   : > { %v465_v56 = vpop.f32.mrb[6].mxu1 }
 0x174   : > { %v1566_v57 = vpop.f32.mrb[7].mxu1 }
 0x177   : > { %v547_v58 = vpop.f32.mrb[8].mxu0 }
 0x178   : > { %v594_v59 = vadd.f32 %v547_v58, %v422_v49  ;;  %v549_v60 = vpop.f32.mrb[9].mxu0 }
 0x179   : > { %v595_v61 = vadd.f32 %v549_v60, %v424_v51  ;;  %v551_v62 = vpop.f32.mrb[10].mxu0  ;;  %v588_v63 = vpop.f32.mrb[8].mxu1 }
 0x17a   : > { %v596_v0 = vadd.f32 %v588_v63, %v463_v6  ;;  %v552_v1 = vpop.f32.mrb[11].mxu0  ;;  %v1571_v2 = vpop.f32.mrb[9].mxu1 }
 0x17b   : > { %v591_v3 = vpop.f32.mrb[10].mxu1 }
 0x17c   : > { %v1572_v4 = vpop.f32.mrb[11].mxu1 }
 0x17f   : > { %v676_v5 = vpop.f32.mrb[12].mxu0 }
 0x180   : > { %v723_v8 = vadd.f32 %v676_v5, %v594_v59  ;;  %v678_v9 = vpop.f32.mrb[13].mxu0 }
 0x181   : > { %v724_v10 = vadd.f32 %v678_v9, %v595_v61  ;;  %v680_v11 = vpop.f32.mrb[14].mxu0  ;;  %v717_v12 = vpop.f32.mrb[12].mxu1 }
 0x182   : > { %v725_v13 = vadd.f32 %v717_v12, %v596_v0  ;;  %v681_v14 = vpop.f32.mrb[15].mxu0  ;;  %v1577_v15 = vpop.f32.mrb[13].mxu1 }
 0x183   : > { %v720_v16 = vpop.f32.mrb[14].mxu1  ;;  %v1375_v61 = vpop.permute.xlu0 %1374 }
 0x184   : > { %v1578_v17 = vpop.f32.mrb[15].mxu1 }
 0x187   : > { %v805_v18 = vpop.f32.mrb[16].mxu0 }
 0x188   : > { %v852_v19 = vadd.f32 %v805_v18, %v723_v8  ;;  %v807_v20 = vpop.f32.mrb[17].mxu0 }
 0x189   : > { %v853_v21 = vadd.f32 %v807_v20, %v724_v10  ;;  %v809_v22 = vpop.f32.mrb[18].mxu0  ;;  %v846_v23 = vpop.f32.mrb[16].mxu1 }
 0x18a   : > { %v854_v24 = vadd.f32 %v846_v23, %v725_v13  ;;  %v810_v25 = vpop.f32.mrb[19].mxu0  ;;  %v1583_v26 = vpop.f32.mrb[17].mxu1 }
 0x18b   : > { %v849_v27 = vpop.f32.mrb[18].mxu1 }
 0x18c   : > { %v1584_v28 = vpop.f32.mrb[19].mxu1 }
 0x18f   : > { %v934_v29 = vpop.f32.mrb[20].mxu0 }
 0x190   : > { %v981_v30 = vadd.f32 %v934_v29, %v852_v19  ;;  %v936_v31 = vpop.f32.mrb[21].mxu0 }
 0x191   : > { %v982_v32 = vadd.f32 %v936_v31, %v853_v21  ;;  %v938_v33 = vpop.f32.mrb[22].mxu0  ;;  %v975_v34 = vpop.f32.mrb[20].mxu1 }
 0x192   : > { %v983_v35 = vadd.f32 %v975_v34, %v854_v24  ;;  %v939_v36 = vpop.f32.mrb[23].mxu0  ;;  %v1589_v37 = vpop.f32.mrb[21].mxu1 }
 0x193   : > { %v978_v38 = vpop.f32.mrb[22].mxu1 }
 0x194   : > { %v1590_v39 = vpop.f32.mrb[23].mxu1 }
 0x197   : > { %v1063_v40 = vpop.f32.mrb[24].mxu0 }
 0x198   : > { %v1110_v41 = vadd.f32 %v1063_v40, %v981_v30  ;;  %v1065_v42 = vpop.f32.mrb[25].mxu0 }
 0x199   : > { %v1111_v43 = vadd.f32 %v1065_v42, %v982_v32  ;;  %v1067_v44 = vpop.f32.mrb[26].mxu0  ;;  %v1104_v45 = vpop.f32.mrb[24].mxu1 }
 0x19a   : > { %v1112_v46 = vadd.f32 %v1104_v45, %v983_v35  ;;  %v1068_v47 = vpop.f32.mrb[27].mxu0  ;;  %v1595_v48 = vpop.f32.mrb[25].mxu1 }
 0x19b   : > { %v1107_v7 = vpop.f32.mrb[26].mxu1 }
 0x19c   : > { %v1596_v49 = vpop.f32.mrb[27].mxu1 }
 0x19f   : > { %v1192_v50 = vpop.f32.mrb[28].mxu0 }
 0x1a0   : > { %v1239_v51 = vadd.f32 %v1192_v50, %v1110_v41  ;;  %v1194_v52 = vpop.f32.mrb[29].mxu0 }
 0x1a1   : > { %v1240_v53 = vadd.f32 %v1194_v52, %v1111_v43  ;;  %v1196_v6 = vpop.f32.mrb[30].mxu0  ;;  %v1233_v54 = vpop.f32.mrb[28].mxu1 }
 0x1a2   : > { %v1241_v55 = vadd.f32 %v1233_v54, %v1112_v46  ;;  %v1197_v56 = vpop.f32.mrb[31].mxu0  ;;  %v1601_v57 = vpop.f32.mrb[29].mxu1 }
 0x1a3   : > { %v1236_v58 = vpop.f32.mrb[30].mxu1 }
 0x1a4   : > { %v1602_v59 = vpop.f32.mrb[31].mxu1 }
 0x1a7   : > { %v1321_v60 = vpop.f32.mrb[32].mxu0 }
 0x1a8   : > { %v1368_v62 = vadd.f32 %v1321_v60, %v1239_v51  ;;  %v1323_v63 = vpop.f32.mrb[33].mxu0 }
 0x1a9   : > { %v1369_v0 = vadd.f32 %v1323_v63, %v1240_v53  ;;  %v1325_v1 = vpop.f32.mrb[34].mxu0  ;;  %v1362_v2 = vpop.f32.mrb[32].mxu1 }
 0x1aa   : > { %v1377_v3 = vadd.f32 %v1375_v61, %v1368_v62  ;;  %v1370_v4 = vadd.f32 %v1362_v2, %v1241_v55  ;;  %v1326_v5 = vpop.f32.mrb[35].mxu0  ;;  %v1607_v8 = vpop.f32.mrb[33].mxu1 }
 0x1ab   : > { %v1378_v9 = vadd.f32 %v1375_v61, %v1369_v0  ;;  %v1365_v10 = vpop.f32.mrb[34].mxu1 }
 0x1ac   : > { %1380 = vst [vmem:[%s226_s13] sm:$0xff] %v1377_v3  ;;  %v1379_v11 = vadd.f32 %v1375_v61, %v1370_v4  ;;  %v1608_v12 = vpop.f32.mrb[35].mxu1 }
 0x1ad   : > { %1381 = vst [vmem:[%s226_s13 + $0x8] sm:$0xff] %v1378_v9 }
 0x1ae   : > { %1382 = vst [vmem:[%s226_s13 + $0x10] sm:$0xff] %v1379_v11 }
 0x1af PF: > { %s13_s16 = sadd.s32 1, %s1705_s16   ;;  %s1910_s12 = smov %s1697_s14 }
 0x1b0   : > { %p10_p7 = scmp.ge.s32.totalorder %s13_s16, 10   ;;  %s1911_s13 = smov %s1701_s15 }
 0x1b1   : > { %s1912_s14 = smov %s1915_s17  ;;  %s1913_s15 = smov %s1919_s18 }
 0x1b2   :  { %12 = sbr.rel (!%p10_p7) target bundleno = 3 (0x3), region = 73 }

</bundles_post_ra>
